<compile_context>
chip_gen: v7x
topology: tpu7x:2x2x1
jax: 0.10.0
libtpu: 0.0.40
codegen_flags: <defaults>
</compile_context>

<pallas_src>
import functools
import math

import jax
import jax.numpy as jnp
from jax import lax
from jax.experimental import pallas as pl
from jax.experimental.pallas import tpu as pltpu


def _round_up(x, m):
    return ((x + m - 1) // m) * m


def _make_attn_kernel(scale, tile_k, use_mask):
    """Builds the flash-style attention kernel body (specialized on use_mask)."""

    def _body(q_ref, k_ref, v_ref, vl_ref, o_ref, m_ref, l_ref, acc_ref):
        kv = pl.program_id(2)

        @pl.when(kv == 0)
        def _init():
            m_ref[...] = jnp.full_like(m_ref, -1e30)
            l_ref[...] = jnp.zeros_like(l_ref)
            acc_ref[...] = jnp.zeros_like(acc_ref)

        # Fold 1/sqrt(d) into q: O(tile_q*d) multiplies instead of O(tile_q*tile_k).
        q = q_ref[0] * jnp.array(scale, dtype=q_ref.dtype)       # (tq, d)
        k = k_ref[0]                                             # (tk, d)

        # scores = q @ k^T via dot_general contracting the last dim of both
        # operands -> no explicit transpose of k is emitted (XLU stays free).
        s = lax.dot_general(q, k, (((1,), (1,)), ((), ())),
                            preferred_element_type=jnp.float32)  # (tq, tk) f32

        if use_mask:
            # d2l masked_softmax semantics: positions >= valid_len get -1e6.
            vl = vl_ref[0]                                       # (tq, 1) int32
            col = lax.broadcasted_iota(jnp.int32, s.shape, 1) + kv * tile_k
            s = jnp.where(col < vl, s, jnp.float32(-1e6))

        # Exact online-softmax update.
        m_prev = m_ref[...]
        m_new = jnp.maximum(m_prev, jnp.max(s, axis=-1, keepdims=True))
        corr = jnp.exp(m_prev - m_new)
        p = jnp.exp(s - m_new)
        l_ref[...] = corr * l_ref[...] + jnp.sum(p, axis=-1, keepdims=True)
        acc_ref[...] = corr * acc_ref[...] + lax.dot_general(
            p.astype(v_ref.dtype), v_ref[0], (((1,), (0,)), ((), ())),
            preferred_element_type=jnp.float32)
        m_ref[...] = m_new

        @pl.when(kv == pl.num_programs(2) - 1)
        def _finalize():
            # dropout(p=0) == identity.  Approx reciprocal runs on the EUP slot.
            inv = pl.reciprocal(l_ref[...], approx=True)
            o_ref[0] = (acc_ref[...] * inv).astype(o_ref.dtype)

    if use_mask:
        def kernel(q_ref, k_ref, v_ref, vl_ref, o_ref, m_ref, l_ref, acc_ref):
            _body(q_ref, k_ref, v_ref, vl_ref, o_ref, m_ref, l_ref, acc_ref)
    else:
        def kernel(q_ref, k_ref, v_ref, o_ref, m_ref, l_ref, acc_ref):
            _body(q_ref, k_ref, v_ref, None, o_ref, m_ref, l_ref, acc_ref)
    return kernel


def dot_product_attention(keys, values, queries, valid_lens=None):
    """Pallas equivalent of DotProductAttention.forward (drop_prob=0)."""
    B, Tk, d = keys.shape
    Bq, Tq, dq = queries.shape
    assert Bq == B and dq == d
    dv = values.shape[-1]
    assert values.shape[0] == B and values.shape[1] == Tk

    # --- tile sizes / padded shapes (lane-dense: last dims multiple of 128) ---
    d_p = _round_up(d, 128)
    dv_p = _round_up(dv, 128)
    tile_q = 256 if Tq > 256 else _round_up(Tq, 8)
    tile_k = 512 if Tk > 512 else _round_up(Tk, 128)
    Tq_p = _round_up(Tq, tile_q)
    Tk_p = _round_up(Tk, tile_k)

    q = jnp.pad(queries, ((0, 0), (0, Tq_p - Tq), (0, d_p - d)))
    k = jnp.pad(keys, ((0, 0), (0, Tk_p - Tk), (0, d_p - d)))
    v = jnp.pad(values, ((0, 0), (0, Tk_p - Tk), (0, dv_p - dv)))

    # Masking work is compiled in only if the caller gave valid_lens or Tk was padded.
    use_mask = (valid_lens is not None) or (Tk_p != Tk)
    args = [q, k, v]
    if use_mask:
        if valid_lens is None:
            vl = jnp.full((B, Tq), Tk, dtype=jnp.int32)
        else:
            vl = valid_lens.astype(jnp.int32)
            if vl.ndim == 1:                       # per-batch valid length
                vl = jnp.broadcast_to(vl[:, None], (B, Tq))
            else:                                  # (B, Tq) per-query (d2l 2-D)
                assert vl.shape == (B, Tq)
        vl = jnp.pad(vl, ((0, 0), (0, Tq_p - Tq)), constant_values=max(Tk, 1))
        args.append(vl[..., None])                 # (B, Tq_p, 1) int32

    scale = 1.0 / math.sqrt(d)
    grid = (B, Tq_p // tile_q, Tk_p // tile_k)

    in_specs = [
        pl.BlockSpec((1, tile_q, d_p), lambda b, qi, ki: (b, qi, 0)),    # queries
        pl.BlockSpec((1, tile_k, d_p), lambda b, qi, ki: (b, ki, 0)),    # keys
        pl.BlockSpec((1, tile_k, dv_p), lambda b, qi, ki: (b, ki, 0)),   # values
    ]
    if use_mask:
        in_specs.append(
            pl.BlockSpec((1, tile_q, 1), lambda b, qi, ki: (b, qi, 0)))  # valid lens

    out = pl.pallas_call(
        _make_attn_kernel(scale, tile_k, use_mask),
        out_shape=jax.ShapeDtypeStruct((B, Tq_p, dv_p), queries.dtype),
        grid_spec=pltpu.PrefetchScalarGridSpec(
            num_scalar_prefetch=0,
            grid=grid,
            in_specs=in_specs,
            out_specs=pl.BlockSpec((1, tile_q, dv_p),
                                   lambda b, qi, ki: (b, qi, 0)),
            scratch_shapes=[
                pltpu.VMEM((tile_q, 1), jnp.float32),      # running max
                pltpu.VMEM((tile_q, 1), jnp.float32),      # running sum
                pltpu.VMEM((tile_q, dv_p), jnp.float32),   # output accumulator
            ]),
        compiler_params=pltpu.CompilerParams(
            # batch & q-tile axes parallel (2 TCs on v7x); kv reduction arbitrary.
            dimension_semantics=("parallel", "parallel", "arbitrary"),
            vmem_limit_bytes=32 * 1024 * 1024),
    )(*args)

    return out[:, :Tq, :dv]


def _reference(keys, values, queries, valid_lens=None):
    d = queries.shape[-1]
    scores = jnp.einsum("bqd,bkd->bqk", queries, keys) / math.sqrt(d)
    if valid_lens is not None:
        col = jnp.arange(keys.shape[1])
        if valid_lens.ndim == 1:
            mask = col[None, None, :] < valid_lens[:, None, None]
        else:
            mask = col[None, None, :] < valid_lens[:, :, None]
        scores = jnp.where(mask, scores, -1e6)
    alpha = jax.nn.softmax(scores, axis=-1)
    return jnp.einsum("bqk,bkv->bqv", alpha, values)


if __name__ == "__main__":
    key = jax.random.PRNGKey(0)
    kq, kk, kv_ = jax.random.split(key, 3)

    # Small shapes consistent with the module: batch=2, Tq=8, Tk=8, d=32, dv=32.
    B, Tq, Tk, d, dv = 2, 8, 8, 32, 32
    queries = jax.random.normal(kq, (B, Tq, d), dtype=jnp.float32)
    keys = jax.random.normal(kk, (B, Tk, d), dtype=jnp.float32)
    values = jax.random.normal(kv_, (B, Tk, dv), dtype=jnp.float32)

    tol = dict(atol=2e-3, rtol=2e-3)   # approx (EUP) reciprocal in the finalize

    # 1-D (per-batch) valid_lens.
    valid_lens = jnp.array([3, 6], dtype=jnp.int32)
    out = jax.block_until_ready(
        dot_product_attention(keys, values, queries, valid_lens))
    assert out.shape == (B, Tq, dv)
    assert jnp.allclose(out, _reference(keys, values, queries, valid_lens), **tol)

    # 2-D (per-query) valid_lens.
    vl2 = jnp.tile(jnp.arange(1, Tq + 1, dtype=jnp.int32)[None, :], (B, 1))
    out2 = jax.block_until_ready(
        dot_product_attention(keys, values, queries, vl2))
    assert jnp.allclose(out2, _reference(keys, values, queries, vl2), **tol)

    # valid_lens=None (still masked internally because Tk is padded to 128).
    out3 = jax.block_until_ready(
        dot_product_attention(keys, values, queries, None))
    assert jnp.allclose(out3, _reference(keys, values, queries, None), **tol)

    # Aligned shapes: exercises the mask-free kernel variant.
    B2, Tq2, Tk2, d2, dv2 = 2, 16, 128, 128, 128
    q2 = jax.random.normal(kq, (B2, Tq2, d2), dtype=jnp.float32)
    k2 = jax.random.normal(kk, (B2, Tk2, d2), dtype=jnp.float32)
    v2 = jax.random.normal(kv_, (B2, Tk2, dv2), dtype=jnp.float32)
    out4 = jax.block_until_ready(dot_product_attention(k2, v2, q2, None))
    assert jnp.allclose(out4, _reference(k2, v2, q2, None), **tol)

    print("KERNEL_OK")
</pallas_src>

<mosaic_0001>
module attributes {stable_mosaic.version = 11 : i64} {
  func.func @kernel(%arg0: i32, %arg1: i32, %arg2: i32, %arg3: memref<1x8x128xf32, #tpu.memory_space<vmem>>, %arg4: memref<1x128x128xf32, #tpu.memory_space<vmem>>, %arg5: memref<1x128x128xf32, #tpu.memory_space<vmem>>, %arg6: memref<1x8x1xi32, #tpu.memory_space<vmem>>, %arg7: memref<1x8x128xf32, #tpu.memory_space<vmem>>, %arg8: memref<8x1xf32, #tpu.memory_space<vmem>>, %arg9: memref<8x1xf32, #tpu.memory_space<vmem>>, %arg10: memref<8x128xf32, #tpu.memory_space<vmem>>) attributes {dimension_semantics = [#tpu.dimension_semantics<parallel>, #tpu.dimension_semantics<parallel>, #tpu.dimension_semantics<arbitrary>], iteration_bounds = array<i64: 2, 1, 1>, scalar_prefetch = 0 : i64, scratch_operands = 3 : i64, tpu.core_type = #tpu.core_type<tc>, window_params = [{transform_indices = @transform_0, window_bounds = array<i64: 1, 8, 128>}, {transform_indices = @transform_1, window_bounds = array<i64: 1, 128, 128>}, {transform_indices = @transform_2, window_bounds = array<i64: 1, 128, 128>}, {transform_indices = @transform_3, window_bounds = array<i64: 1, 8, 1>}, {transform_indices = @transform_4, window_bounds = array<i64: 1, 8, 128>}]} {
    %c0_i32 = arith.constant 0 : i32
    %0 = arith.cmpi eq, %arg2, %c0_i32 : i32
    %1 = arith.extui %0 : i1 to i32
    %c0_i32_0 = arith.constant 0 : i32
    %2 = arith.cmpi ne, %1, %c0_i32_0 : i32
    scf.if %2 {
      %cst_31 = arith.constant -1.000000e+30 : f32
      %47 = vector.broadcast %cst_31 : f32 to vector<8x1xf32>
      %c0_32 = arith.constant 0 : index
      %c0_33 = arith.constant 0 : index
      %48 = vector.load %arg8[%c0_32, %c0_33] : memref<8x1xf32, #tpu.memory_space<vmem>>, vector<8x1xf32>
      tpu.vector_store %arg8[%c0_32, %c0_33], %47 {strides = array<i32>} : memref<8x1xf32, #tpu.memory_space<vmem>>, vector<8x1xf32>,
      %cst_34 = arith.constant 0.000000e+00 : f32
      %49 = vector.broadcast %cst_34 : f32 to vector<8x1xf32>
      %c0_35 = arith.constant 0 : index
      %c0_36 = arith.constant 0 : index
      %50 = vector.load %arg9[%c0_35, %c0_36] : memref<8x1xf32, #tpu.memory_space<vmem>>, vector<8x1xf32>
      tpu.vector_store %arg9[%c0_35, %c0_36], %49 {strides = array<i32>} : memref<8x1xf32, #tpu.memory_space<vmem>>, vector<8x1xf32>,
      %cst_37 = arith.constant 0.000000e+00 : f32
      %51 = vector.broadcast %cst_37 : f32 to vector<8x128xf32>
      %c0_38 = arith.constant 0 : index
      %c0_39 = arith.constant 0 : index
      %52 = vector.load %arg10[%c0_38, %c0_39] : memref<8x128xf32, #tpu.memory_space<vmem>>, vector<8x128xf32>
      tpu.vector_store %arg10[%c0_38, %c0_39], %51 {strides = array<i32>} : memref<8x128xf32, #tpu.memory_space<vmem>>, vector<8x128xf32>,
    } else {
    }
    %c0 = arith.constant 0 : index
    %c0_1 = arith.constant 0 : index
    %c0_2 = arith.constant 0 : index
    %3 = vector.load %arg3[%c0, %c0_1, %c0_2] : memref<1x8x128xf32, #tpu.memory_space<vmem>>, vector<1x8x128xf32>
    %4 = vector.shape_cast %3 : vector<1x8x128xf32> to vector<8x128xf32>
    %cst = arith.constant 0.176776692 : f32
    %5 = vector.broadcast %cst : f32 to vector<8x128xf32>
    %6 = arith.mulf %4, %5 : vector<8x128xf32>
    %c0_3 = arith.constant 0 : index
    %c0_4 = arith.constant 0 : index
    %c0_5 = arith.constant 0 : index
    %7 = vector.load %arg4[%c0_3, %c0_4, %c0_5] : memref<1x128x128xf32, #tpu.memory_space<vmem>>, vector<1x128x128xf32>
    %8 = vector.shape_cast %7 : vector<1x128x128xf32> to vector<128x128xf32>
    %cst_6 = arith.constant dense<0.000000e+00> : vector<8x128xf32>
    %9 = tpu.matmul %6, %8, %cst_6 {dimension_numbers = #tpu.dot_dimension_numbers<[1], [1], [0], [0], [0, 0, 1, 0], [], []>} : vector<8x128xf32>, vector<128x128xf32>, vector<8x128xf32> -> vector<8x128xf32>
    %c0_7 = arith.constant 0 : index
    %c0_8 = arith.constant 0 : index
    %c0_9 = arith.constant 0 : index
    %10 = vector.load %arg6[%c0_7, %c0_8, %c0_9] : memref<1x8x1xi32, #tpu.memory_space<vmem>>, vector<1x8x1xi32>
    %11 = vector.shape_cast %10 : vector<1x8x1xi32> to vector<8x1xi32>
    %12 = tpu.iota {dimensions = array<i32: 1>} : vector<8x128xi32>
    %c128_i32 = arith.constant 128 : i32
    %13 = arith.muli %arg2, %c128_i32 : i32
    %14 = vector.broadcast %13 : i32 to vector<8x128xi32>
    %15 = arith.addi %12, %14 : vector<8x128xi32>
    %16 = vector.broadcast %11 : vector<8x1xi32> to vector<8x128xi32>
    %17 = arith.cmpi slt, %15, %16 : vector<8x128xi32>
    %cst_10 = arith.constant -1.000000e+06 : f32
    %18 = vector.broadcast %cst_10 : f32 to vector<8x128xf32>
    %19 = arith.select %17, %9, %18 : vector<8x128xi1>, vector<8x128xf32>
    %c0_11 = arith.constant 0 : index
    %c0_12 = arith.constant 0 : index
    %20 = vector.load %arg8[%c0_11, %c0_12] : memref<8x1xf32, #tpu.memory_space<vmem>>, vector<8x1xf32>
    %cst_13 = arith.constant dense<0xFF800000> : vector<8xf32>
    %21 = vector.multi_reduction <maximumf>, %19, %cst_13 [1] : vector<8x128xf32> to vector<8xf32>
    %22 = vector.shape_cast %21 : vector<8xf32> to vector<8x1xf32>
    %23 = arith.maximumf %20, %22 : vector<8x1xf32>
    %24 = arith.subf %20, %23 : vector<8x1xf32>
    %25 = math.exp %24 : vector<8x1xf32>
    %26 = vector.broadcast %23 : vector<8x1xf32> to vector<8x128xf32>
    %27 = arith.subf %19, %26 : vector<8x128xf32>
    %28 = math.exp %27 : vector<8x128xf32>
    %c0_14 = arith.constant 0 : index
    %c0_15 = arith.constant 0 : index
    %29 = vector.load %arg9[%c0_14, %c0_15] : memref<8x1xf32, #tpu.memory_space<vmem>>, vector<8x1xf32>
    %30 = arith.mulf %25, %29 : vector<8x1xf32>
    %cst_16 = arith.constant dense<0.000000e+00> : vector<8xf32>
    %31 = vector.multi_reduction <add>, %28, %cst_16 [1] : vector<8x128xf32> to vector<8xf32>
    %32 = vector.shape_cast %31 : vector<8xf32> to vector<8x1xf32>
    %33 = arith.addf %30, %32 : vector<8x1xf32>
    %c0_17 = arith.constant 0 : index
    %c0_18 = arith.constant 0 : index
    %34 = vector.load %arg9[%c0_17, %c0_18] : memref<8x1xf32, #tpu.memory_space<vmem>>, vector<8x1xf32>
    tpu.vector_store %arg9[%c0_17, %c0_18], %33 {strides = array<i32>} : memref<8x1xf32, #tpu.memory_space<vmem>>, vector<8x1xf32>,
    %c0_19 = arith.constant 0 : index
    %c0_20 = arith.constant 0 : index
    %35 = vector.load %arg10[%c0_19, %c0_20] : memref<8x128xf32, #tpu.memory_space<vmem>>, vector<8x128xf32>
    %36 = vector.broadcast %25 : vector<8x1xf32> to vector<8x128xf32>
    %37 = arith.mulf %36, %35 : vector<8x128xf32>
    %c0_21 = arith.constant 0 : index
    %c0_22 = arith.constant 0 : index
    %c0_23 = arith.constant 0 : index
    %38 = vector.load %arg5[%c0_21, %c0_22, %c0_23] : memref<1x128x128xf32, #tpu.memory_space<vmem>>, vector<1x128x128xf32>
    %39 = vector.shape_cast %38 : vector<1x128x128xf32> to vector<128x128xf32>
    %cst_24 = arith.constant dense<0.000000e+00> : vector<8x128xf32>
    %40 = tpu.matmul %28, %39, %cst_24 {dimension_numbers = #tpu.dot_dimension_numbers<[1], [0], [0], [1], [0, 0, 1, 1], [], []>} : vector<8x128xf32>, vector<128x128xf32>, vector<8x128xf32> -> vector<8x128xf32>
    %41 = arith.addf %37, %40 : vector<8x128xf32>
    %c0_25 = arith.constant 0 : index
    %c0_26 = arith.constant 0 : index
    %42 = vector.load %arg10[%c0_25, %c0_26] : memref<8x128xf32, #tpu.memory_space<vmem>>, vector<8x128xf32>
    tpu.vector_store %arg10[%c0_25, %c0_26], %41 {strides = array<i32>} : memref<8x128xf32, #tpu.memory_space<vmem>>, vector<8x128xf32>,
    %c0_27 = arith.constant 0 : index
    %c0_28 = arith.constant 0 : index
    %43 = vector.load %arg8[%c0_27, %c0_28] : memref<8x1xf32, #tpu.memory_space<vmem>>, vector<8x1xf32>
    tpu.vector_store %arg8[%c0_27, %c0_28], %23 {strides = array<i32>} : memref<8x1xf32, #tpu.memory_space<vmem>>, vector<8x1xf32>,
    %c0_i32_29 = arith.constant 0 : i32
    %44 = arith.cmpi eq, %arg2, %c0_i32_29 : i32
    %45 = arith.extui %44 : i1 to i32
    %c0_i32_30 = arith.constant 0 : i32
    %46 = arith.cmpi ne, %45, %c0_i32_30 : i32
    scf.if %46 {
      %c0_31 = arith.constant 0 : index
      %c0_32 = arith.constant 0 : index
      %47 = vector.load %arg9[%c0_31, %c0_32] : memref<8x1xf32, #tpu.memory_space<vmem>>, vector<8x1xf32>
      %48 = tpu.reciprocal %47 {approx = true} : vector<8x1xf32> -> vector<8x1xf32>
      %c0_33 = arith.constant 0 : index
      %c0_34 = arith.constant 0 : index
      %49 = vector.load %arg10[%c0_33, %c0_34] : memref<8x128xf32, #tpu.memory_space<vmem>>, vector<8x128xf32>
      %50 = vector.broadcast %48 : vector<8x1xf32> to vector<8x128xf32>
      %51 = arith.mulf %49, %50 : vector<8x128xf32>
      %c0_35 = arith.constant 0 : index
      %c0_36 = arith.constant 0 : index
      %c0_37 = arith.constant 0 : index
      %52 = vector.load %arg7[%c0_35, %c0_36, %c0_37] : memref<1x8x128xf32, #tpu.memory_space<vmem>>, vector<1x8x128xf32>
      %53 = vector.shape_cast %52 : vector<1x8x128xf32> to vector<8x128xf32>
      %54 = vector.shape_cast %51 : vector<8x128xf32> to vector<1x8x128xf32>
      tpu.vector_store %arg7[%c0_35, %c0_36, %c0_37], %54 {strides = array<i32>} : memref<1x8x128xf32, #tpu.memory_space<vmem>>, vector<1x8x128xf32>,
    } else {
    }
    return
  }
  func.func @transform_0(%arg0: i32, %arg1: i32, %arg2: i32) -> (i32, i32, i32) {
    %c0_i32 = arith.constant 0 : i32
    %c0_i32_0 = arith.constant 0 : i32
    return %arg0, %arg1, %c0_i32 : i32, i32, i32
  }
  func.func @transform_1(%arg0: i32, %arg1: i32, %arg2: i32) -> (i32, i32, i32) {
    %c0_i32 = arith.constant 0 : i32
    %c0_i32_0 = arith.constant 0 : i32
    return %arg0, %arg2, %c0_i32 : i32, i32, i32
  }
  func.func @transform_2(%arg0: i32, %arg1: i32, %arg2: i32) -> (i32, i32, i32) {
    %c0_i32 = arith.constant 0 : i32
    %c0_i32_0 = arith.constant 0 : i32
    return %arg0, %arg2, %c0_i32 : i32, i32, i32
  }
  func.func @transform_3(%arg0: i32, %arg1: i32, %arg2: i32) -> (i32, i32, i32) {
    %c0_i32 = arith.constant 0 : i32
    %c0_i32_0 = arith.constant 0 : i32
    return %arg0, %arg1, %c0_i32 : i32, i32, i32
  }
  func.func @transform_4(%arg0: i32, %arg1: i32, %arg2: i32) -> (i32, i32, i32) {
    %c0_i32 = arith.constant 0 : i32
    %c0_i32_0 = arith.constant 0 : i32
    return %arg0, %arg1, %c0_i32 : i32, i32, i32
  }
}

</mosaic_0001>

<bundles_post_ra>
// kernel: tpu_custom_call.1
= control target key start
LH: loop header
LB: loop body
LE: loop exit
PB: predicated region body
PF: predicated region fallthrough
CT: control target
= control target key end

     0   :  { %9 = vsyncpa [#allocation6], 0  ;;  %s1482_s0 = inlined_call_operand.vmem [shape: f32[2,8,128], index: 0, kind: input, shape index: {}]   ;;  %s1483_s1 = inlined_call_operand.hbm [shape: f32[2,128,128], index: 1, kind: input, shape index: {}]   ;;  %s1484_s2 = inlined_call_operand.hbm [shape: f32[2,128,128], index: 2, kind: input, shape index: {}]   ;;  %s1485_s3 = inlined_call_operand.vmem [shape: s32[2,8,1], index: 3, kind: input, shape index: {}]   ;;  %s1486_s4 = inlined_call_operand.hbm [shape: f32[2,8,128], index: 4, kind: output, shape index: {}]  }
   0x1   :  { %11 = vsyncpa [#allocation6 + $0x1], 0 }
   0x2   :  { %12 = vsyncpa [#allocation9], 0 }
   0x3   :  { %14 = vsyncpa [#allocation9 + $0x1], 0 }
   0x4   :  { %15 = vsyncpa [#allocation7], 0 }
   0x5   :  { %17 = vsyncpa [#allocation7 + $0x1], 0  ;;  %s1176_s15 = smov 0   ;;  %s1178_s16 = smov 0  }
   0x6   :  { %s1180_s17 = smov 0   ;;  %s1182_s18 = smov 0  }
   0x7   :  { %s1184_s19 = smov 0   ;;  %s1186_s20 = smov 0  }
   0x8 LB: > { %s737_s21 = sadd.s32 4294967295, %s1139_s20   ;;  %s738_s22 = sadd.s32 4294967294, %s1139_s20   ;;  %s1139_s20 = sphi %s1186_s20, %s23_s20   ;;  %s1135_s19 = sphi %s1184_s19, %s1506_s19   ;;  %s1131_s18 = sphi %s1182_s18, %s1505_s18   ;;  %s1127_s17 = sphi %s1180_s17, %s1504_s17   ;;  %s1123_s16 = sphi %s1178_s16, %s1503_s16   ;;  %s1119_s15 = sphi %s1176_s15, %s1502_s15  }
   0x9   : > { %s42_s23 = sadd.s32 1, %s1135_s19  ;;  %s79_s24 = sadd.s32 1, %s1127_s17 }
   0xa   : > { %p44_p0 = scmp.ge.s32.totalorder %s42_s23, 2  ;;  %p86_p1 = scmp.ne.s32.totalorder %s1127_s17, %s1123_s16 }
   0xb   : > { %p87_p2 = scmp.eq.s32.totalorder %s1139_s20, 0  ;;  %p92_p3 = scmp.ne.s32.totalorder %s1123_s16, %s1119_s15 }
   0xc   : > { %s1508_s23 = smov (%p44_p0, %s42_s23), 0  ;;  %p93_p5 = scmp.eq.s32.totalorder %s737_s21, 0 }
   0xd   : > { %p1217_p4 = por %p87_p2, %p86_p1  ;;  %s74_s26 = ssub.s32 %s1135_s19, %s1508_s23 }
   0xe   : > { %p174_p6 = scmp.eq.s32.totalorder %s737_s21, 1  ;;  %p77_p7 = scmp.eq.s32.totalorder %s74_s26, 0 }
   0xf   : > { %p1223_p8 = por %p93_p5, %p92_p3  ;;  %p180_p10 = scmp.eq.s32.totalorder %s738_s22, 1 }
  0x10   : > { %p1227_p9 = por %p174_p6, %p86_p1  ;;  %p928_p13 = scmp.lt.s32.totalorder %s1139_s20, 2 }
  0x11   : > { %s1491_s27 = scalar_select %p1223_p8, 1, 0 }
  0x12   : > { %s1492_s28 = scalar_select %p1227_p9, 1, 0 }
  0x13   : > { %s1232_s29 = scalar_select %p77_p7, %s1127_s17, %s79_s24  }
  0x14   : > { %p1234_p11 = por %p180_p10, %p92_p3  ;;  %s1241_s5 = sand.u32 1, %s1127_s17  }
  0x15   : > { %s741_s6 = sshll.u32 %s1241_s5, 7  ;;  %s757_s7 = sshll.u32 %s1135_s19, 11 }
  0x16   : > { %s1493_s30 = scalar_select %p1234_p11, 1, 0 }
  0x17   : > { %s1250_s10 = scalar_lea.hbm %s1483_s1, %s757_s7  ;;  %s214_s11 = scalar_lea.vmem [#allocation5], %s741_s6 }
  0x18   : > { %s223_s12 = sshll.u32 %s214_s11, 4  ;;  %p1258_p0 = pnand %p928_p13, %p1217_p4  ;;  %s1254_s12 = int_to_ptr.vmem [resolvable:$true] %s223_s12 }
  0x19   : > { %s211_s14 = scalar_lea.sflag [#allocation6], %s1241_s5  ;;  %s993_s21 = scalar_lea.hbm %s1250_s10, 2048 }
  0x1a   : > { %p994_p2 = scmp.ne.s32.totalorder %s1250_s10, %s993_s21  ;;  %p995_p3 = pneg %p1258_p0 }
  0x1b   : > { %s998_s25 = scalar_lea.hbm %s1483_s1, 4096  ;;  %p999_p4 = scmp.lt.u32.totalorder %s1250_s10, %s1483_s1 }
  0x1c   : > { %p996_p5 = pnand %p995_p3, %p994_p2  ;;  %p1000_p7 = scmp.lt.u32.totalorder %s998_s25, %s993_s21 }
  0x1d   : > { %p1002_p13 = scmp.lt.u32.totalorder %s993_s21, %s1250_s10 }
  0x1e   : > { %p997_p6 = pneg %p996_p5  ;;  %p1001_p10 = por %p1000_p7, %p999_p4 }
  0x20   : > { %p1003_p12 = por %p1002_p13, %p1001_p10 }
  0x22   : > { %p1004_p1 = pnand %p1003_p12, %p997_p6 }
  0x24   : > { %1007 = shalt.err (!%p1004_p1)
}
  0x25   : > { %s1008_s9 = scalar_lea.vmem %s1254_s12, 2048  ;;  %s1141_s11 = smov [#allocation5]  }
  0x26   : > { %p1009_p2 = scmp.ne.s32.totalorder %s1254_s12, %s1008_s9  ;;  %s1013_s22 = sshll.u32 %s1141_s11, 4  ;;  %s1014_s22 = int_to_ptr.vmem [resolvable:$false] %s1013_s22 }
  0x27   : > { %s1015_s24 = scalar_lea.vmem %s1014_s22, 4096  ;;  %p1016_p9 = scmp.lt.s32.totalorder %s1254_s12, %s1014_s22 }
  0x28   : > { %p1011_p5 = pnand %p1009_p2, %p995_p3  ;;  %p1017_p4 = scmp.lt.s32.totalorder %s1015_s24, %s1008_s9 }
  0x2a   : > { %p1012_p11 = pneg %p1011_p5  ;;  %p1018_p7 = por %p1017_p4, %p1016_p9 }
  0x2c   : > { %p1019_p10 = pnand %p1018_p7, %p1012_p11 }
  0x2e   : > { %1022 = shalt.err (!%p1019_p10)
}
  0x2f   : > { %s1488_s21 = smov 128   ;;  %s1143_s25 = smov 8  }
  0x30   : > { %920 = dma.hbm_to_vmem [thread:$0]  (!%p1258_p0), %s1250_s10, 2048, %s1254_s12, %s211_s14, %s1488_s21, %s1488_s21, %s1143_s25  }
  0x31   : > { %p264_p9 = scmp.lt.s32.totalorder %s1139_s20, 3  ;;  %s1300_s9 = scalar_lea.hbm %s1484_s2, %s757_s7 }
  0x32   : > { %p1495_p11 = scmp.ge.s32.totalorder %s1139_s20, 1  ;;  %s237_s22 = scalar_lea.vmem [#allocation8], %s741_s6 }
  0x33   : > { %s246_s24 = sshll.u32 %s237_s22, 4  ;;  %s234_s10 = scalar_lea.sflag [#allocation9], %s1241_s5  ;;  %s1310_s24 = int_to_ptr.vmem [resolvable:$true] %s246_s24 }
  0x34   : > { %p1304_p12 = pnand %p1495_p11, %p264_p9  ;;  %s1023_s12 = scalar_lea.hbm %s1300_s9, 2048 }
  0x35   : > { %p1024_p1 = scmp.ne.s32.totalorder %s1300_s9, %s1023_s12  ;;  %s1028_s26 = scalar_lea.hbm %s1484_s2, 4096 }
  0x36   : > { %p1029_p2 = scmp.lt.u32.totalorder %s1300_s9, %s1484_s2  ;;  %p1030_p5 = scmp.lt.u32.totalorder %s1028_s26, %s1023_s12 }
  0x37   : > { %p1026_p6 = pnand %p1024_p1, %p995_p3  ;;  %p1032_p7 = scmp.lt.u32.totalorder %s1023_s12, %s1300_s9 }
  0x38   : > { %p1031_p4 = por %p1030_p5, %p1029_p2 }
  0x39   : > { %p1027_p13 = pneg %p1026_p6 }
  0x3a   : > { %p1033_p10 = por %p1032_p7, %p1031_p4 }
  0x3c   : > { %p1034_p9 = pnand %p1033_p10, %p1027_p13 }
  0x3e   : > { %1037 = shalt.err (!%p1034_p9)
}
  0x3f   : > { %s1038_s6 = scalar_lea.vmem %s1310_s24, 2048  ;;  %s1144_s22 = smov [#allocation8]  }
  0x40   : > { %p1039_p11 = scmp.ne.s32.totalorder %s1310_s24, %s1038_s6  ;;  %s1043_s7 = sshll.u32 %s1144_s22, 4  ;;  %s1044_s7 = int_to_ptr.vmem [resolvable:$false] %s1043_s7 }
  0x41   : > { %s1045_s21 = scalar_lea.vmem %s1044_s7, 4096  ;;  %p1046_p8 = scmp.lt.s32.totalorder %s1310_s24, %s1044_s7 }
  0x42   : > { %p1041_p1 = pnand %p1039_p11, %p995_p3  ;;  %p1047_p2 = scmp.lt.s32.totalorder %s1045_s21, %s1038_s6 }
  0x44   : > { %p1042_p6 = pneg %p1041_p1  ;;  %p1048_p5 = por %p1047_p2, %p1046_p8 }
  0x46   : > { %p1049_p4 = pnand %p1048_p5, %p1042_p6 }
  0x48   : > { %1052 = shalt.err (!%p1049_p4)
}
  0x49   : > { %s1497_s12 = smov 128   ;;  %268 = sbr.rel (%p1304_p12) target bundleno = 958 (0x3be), region = 36 }
  0x4a   : > { %923 = dma.hbm_to_vmem [thread:$0]  (!%p1258_p0), %s1300_s9, 2048, %s1310_s24, %s234_s10, %s1497_s12, %s1497_s12, %s1143_s25  }
  0x4b   : > { %s1344_s14 = sand.u32 (!%p1304_p12), 1, %s1123_s16   ;;  %p1498_p8 = scmp.ne.s32.totalorder (!%p1304_p12), %s1491_s27, 0 }
  0x4c   : > { %s748_s26 = sshll.u32 (!%p1304_p12), %s1344_s14, 7  ;;  %s271_s8 = scalar_lea.sflag (!%p1304_p12), [#allocation6], %s1344_s14 }
  0x4d   : > { %s1348_s13 = scalar_lea.vmem (!%p1304_p12), [#allocation5], %s748_s26 }
  0x50   : > { %1106 = dma.done.wait (%p1498_p8), %s271_s8, 2048  }
  0x51   : > { %1108 = vsyncadd (%p1498_p8), %s271_s8, 4294965248  ;;  %s280_s5 = scalar_lea.sflag [#allocation9], %s1344_s14  ;;  %s1355_s25 = scalar_lea.vmem [#allocation8], %s748_s26 }
  0x52   : > { %1110 = dma.done.wait (%p1498_p8), %s280_s5, 2048  }
  0x53   : > { %1112 = vsyncadd (%p1498_p8), %s280_s5, 4294965248  ;;  %vm347_vm0 = vcmask 7168   ;;  %v1145_v0 = vmov 0.0|0.0   ;;  %v1146_v1 = vmov -1e+30   ;;  %v1147_v2 = vmov 0.0  }
  0x54   : > { %863 = vmatprep.subr.bf16.mxu0 %v1145_v0  ;;  %348 = vst.msk [vmem:[#allocation2] sm:$0xff] %vm347_vm0, %v1146_v1  ;;  %349 = vst.msk [vmem:[#allocation3] sm:$0xff] %vm347_vm0, %v1147_v2  ;;  %p327_p0 = scmp.lt.s32.totalorder %s1131_s18, 1  ;;  %887 = vmatprep.subr.bf16.mxu1 %v1145_v0  ;;  %vm1148_vm1 = vmmov 0   ;;  %v1149_v3 = vmov 0   ;;  %v353_v4 = vld [vmem:[%s1348_s13] sm:$0xff]  ;;  %v440_v31 = vlaneseq }
  0x55   : > { %825 = vmatprep.mubr.msk.f32.mxu0 %vm1148_vm1, %v1147_v2  ;;  %985 = vset.pattern.permute.xlu0 %v1149_v3  ;;  %v354_v5 = vld [vmem:[%s1348_s13 + $0x8] sm:$0xff]  ;;  %v355_v7 = vld [vmem:[%s1348_s13 + $0x10] sm:$0xff]  ;;  %v356_v8 = vld [vmem:[%s1348_s13 + $0x18] sm:$0xff]  ;;  %s750_s21 = sshll.u32 %s1344_s14, 3  ;;  %s754_s12 = sshll.u32 %s1131_s18, 7 }
  0x56   : > { %986 = vset.pattern.permute.xlu1 %v1149_v3  ;;  %860 = vmatprep.mubr.msk.f32.mxu1 %vm1148_vm1, %v1147_v2  ;;  %s1367_s27 = scalar_select %p327_p0, %s1131_s18, 1  ;;  %v864_v6 = vpack.c.bf16 %v354_v5, %v353_v4  ;;  %v867_v10 = vpack.c.bf16 %v356_v8, %v355_v7  ;;  %v357_v11 = vld [vmem:[%s1348_s13 + $0x20] sm:$0xff]  ;;  %v358_v12 = vld [vmem:[%s1348_s13 + $0x28] sm:$0xff]  ;;  %v359_v14 = vld [vmem:[%s1348_s13 + $0x30] sm:$0xff]  ;;  %v441_v32 = vand.u32 127, %v440_v31 }
  0x57   : > { %v870_v13 = vpack.c.bf16 %v358_v12, %v357_v11  ;;  %v360_v15 = vld [vmem:[%s1348_s13 + $0x38] sm:$0xff]  ;;  %v361_v17 = vld [vmem:[%s1348_s13 + $0x40] sm:$0xff]  ;;  %v362_v18 = vld [vmem:[%s1348_s13 + $0x48] sm:$0xff]  ;;  %s326_s26 = scalar_lea.vmem [#allocation10], %s750_s21  ;;  %p1499_p12 = scmp.ne.s32.totalorder %s1492_s28, 0 }
  0x58   : > { %s751_s9 = sshll.u32 %s1367_s27, 3  ;;  %865 = vmatpush3.bf16.xpose.msra.mxu0 %v864_v6  ;;  %v873_v16 = vpack.c.bf16 %v360_v15, %v359_v14  ;;  %v876_v19 = vpack.c.bf16 %v362_v18, %v361_v17  ;;  %v363_v20 = vld [vmem:[%s1348_s13 + $0x50] sm:$0xff]  ;;  %v364_v21 = vld [vmem:[%s1348_s13 + $0x58] sm:$0xff]  ;;  %v365_v23 = vld [vmem:[%s1348_s13 + $0x60] sm:$0xff]  ;;  %s596_s8 = sshll.u32 %s326_s26, 4  ;;  %s1435_s8 = int_to_ptr.vmem [resolvable:$true] %s596_s8 }
  0x59   : > { %s342_s10 = scalar_lea.vmem %s1485_s3, %s751_s9  ;;  %866 = vmatprep.subr.bf16.mxu0 %v1145_v0  ;;  %v879_v22 = vpack.c.bf16 %v364_v21, %v363_v20  ;;  %v366_v24 = vld [vmem:[%s1348_s13 + $0x68] sm:$0xff]  ;;  %v367_v26 = vld [vmem:[%s1348_s13 + $0x70] sm:$0xff]  ;;  %v368_v27 = vld [vmem:[%s1348_s13 + $0x78] sm:$0xff]  ;;  %s333_s7 = scalar_lea.vmem %s1482_s0, %s751_s9 }
  0x5a   : > { %v439_v9 = vld [vmem:[%s342_s10] sm:$0xff]  ;;  %v882_v25 = vpack.c.bf16 %v366_v24, %v365_v23  ;;  %v885_v28 = vpack.c.bf16 %v368_v27, %v367_v26  ;;  %v479_v37 = vld [vmem:[%s1355_s25] sm:$0xff]  ;;  %v480_v38 = vld [vmem:[%s1355_s25 + $0x8] sm:$0xff]  ;;  %s582_s27 = scalar_lea.sflag [#allocation7], %s1344_s14  ;;  %s1053_s9 = scalar_lea.vmem %s1435_s8, 128 }
  0x5b   : > { %446 = vperm.xlu0 %985, %v439_v9   ;;  %v351_v29 = vld [vmem:[%s333_s7] sm:$0xff]  ;;  %v888_v40 = vpack.c.bf16 %v480_v38, %v479_v37  ;;  %v482_v41 = vld [vmem:[%s1355_s25 + $0x18] sm:$0xff]  ;;  %v483_v43 = vld [vmem:[%s1355_s25 + $0x20] sm:$0xff]  ;;  %p1054_p3 = scmp.ne.s32.totalorder %s1435_s8, %s1053_s9  ;;  %s1150_s18 = smov [#allocation10]  }
  0x5c   : > { %v352_v30 = vmul.f32 0.17677669, %v351_v29  ;;  %v481_v39 = vld [vmem:[%s1355_s25 + $0x10] sm:$0xff]  ;;  %v484_v44 = vld [vmem:[%s1355_s25 + $0x28] sm:$0xff]  ;;  %v486_v47 = vld [vmem:[%s1355_s25 + $0x38] sm:$0xff]  ;;  %s1057_s11 = sshll.u32 %s1150_s18, 4  ;;  %s1058_s11 = int_to_ptr.vmem [resolvable:$false] %s1057_s11 }
  0x5d   : > { %889 = vmatpush3.bf16.msra.mxu1 %v888_v40  ;;  %v891_v42 = vpack.c.bf16 %v482_v41, %v481_v39  ;;  %v894_v45 = vpack.c.bf16 %v484_v44, %v483_v43  ;;  %v485_v46 = vld [vmem:[%s1355_s25 + $0x30] sm:$0xff]  ;;  %v487_v51 = vld [vmem:[%s1355_s25 + $0x40] sm:$0xff]  ;;  %v488_v52 = vld [vmem:[%s1355_s25 + $0x48] sm:$0xff]  ;;  %p1055_p13 = pnand %p1054_p3, %p1499_p12  ;;  %s1059_s24 = scalar_lea.vmem %s1058_s11, 256 }
  0x5e   : > { %890 = vmatprep.subr.bf16.mxu1 %v1145_v0  ;;  %v897_v48 = vpack.c.bf16 %v486_v47, %v485_v46  ;;  %v450_v49 = vld [vmem:[#allocation2] sm:$0xff]  ;;  %v900_v54 = vpack.c.bf16 %v488_v52, %v487_v51  ;;  %v490_v57 = vld [vmem:[%s1355_s25 + $0x58] sm:$0xff]  ;;  %v491_v60 = vld [vmem:[%s1355_s25 + $0x60] sm:$0xff]  ;;  %p1060_p10 = scmp.lt.s32.totalorder %s1435_s8, %s1058_s11  ;;  %p1061_p9 = scmp.lt.s32.totalorder %s1059_s24, %s1053_s9 }
  0x5f   : > { %v489_v56 = vld [vmem:[%s1355_s25 + $0x50] sm:$0xff]  ;;  %v492_v61 = vld [vmem:[%s1355_s25 + $0x68] sm:$0xff]  ;;  %v494_v1 = vld [vmem:[%s1355_s25 + $0x78] sm:$0xff]  ;;  %p1056_p7 = pneg %p1055_p13 }
  0x60   : > { %868 = vmatpush3.bf16.xpose.msra.mxu0 %v867_v10  ;;  %v903_v59 = vpack.c.bf16 %v490_v57, %v489_v56  ;;  %v906_v62 = vpack.c.bf16 %v492_v61, %v491_v60  ;;  %v493_v63 = vld [vmem:[%s1355_s25 + $0x70] sm:$0xff]  ;;  %v465_v8 = vld [vmem:[#allocation3] sm:$0xff]  ;;  %s1433_s25 = scalar_lea.hbm %s1486_s4, %s754_s12  ;;  %p1062_p11 = por %p1061_p9, %p1060_p10 }
  0x61   : > { %869 = vmatprep.subr.bf16.mxu0 %v1145_v0  ;;  %892 = vmatpush3.bf16.msra.mxu1 %v891_v42  ;;  %v909_v2 = vpack.c.bf16 %v494_v1, %v493_v63 }
  0x62   : > { %893 = vmatprep.subr.bf16.mxu1 %v1145_v0  ;;  %p1063_p1 = pnand %p1062_p11, %p1056_p7 }
  0x65   : > { %895 = vmatpush3.bf16.msra.mxu1 %v894_v45 }
  0x66   : > { %896 = vmatprep.subr.bf16.mxu1 %v1145_v0 }
  0x68   : > { %871 = vmatpush3.bf16.xpose.msra.mxu0 %v870_v13 }
  0x69   : > { %872 = vmatprep.subr.bf16.mxu0 %v1145_v0  ;;  %898 = vmatpush3.bf16.msra.mxu1 %v897_v48 }
  0x6a   : > { %899 = vmatprep.subr.bf16.mxu1 %v1145_v0 }
  0x6d   : > { %901 = vmatpush3.bf16.msra.mxu1 %v900_v54 }
  0x6e   : > { %902 = vmatprep.subr.bf16.mxu1 %v1145_v0 }
  0x70   : > { %874 = vmatpush3.bf16.xpose.msra.mxu0 %v873_v16 }
  0x71   : > { %875 = vmatprep.subr.bf16.mxu0 %v1145_v0  ;;  %904 = vmatpush3.bf16.msra.mxu1 %v903_v59 }
  0x72   : > { %905 = vmatprep.subr.bf16.mxu1 %v1145_v0 }
  0x75   : > { %907 = vmatpush3.bf16.msra.mxu1 %v906_v62 }
  0x76   : > { %908 = vmatprep.subr.bf16.mxu1 %v1145_v0 }
  0x78   : > { %877 = vmatpush3.bf16.xpose.msra.mxu0 %v876_v19 }
  0x79   : > { %878 = vmatprep.subr.bf16.mxu0 %v1145_v0  ;;  %910 = vmatpush3.bf16.msra.mxu1 %v909_v2 }
  0x80   : > { %880 = vmatpush3.bf16.xpose.msra.mxu0 %v879_v22 }
  0x81   : > { %881 = vmatprep.subr.bf16.mxu0 %v1145_v0 }
  0x88   : > { %883 = vmatpush3.bf16.xpose.msra.mxu0 %v882_v25 }
  0x89   : > { %884 = vmatprep.subr.bf16.mxu0 %v1145_v0 }
  0x90   : > { %886 = vmatpush3.bf16.xpose.msra.mxu0 %v885_v28 }
  0x97   : > { %826 = vmatmul.mubr.f32.vlgmr.msra.gmra.mrb[0].mxu0 %v352_v30 }
  0xda   : > { %v447_v33 = vpop.permute.xlu0 %446 }
  0xdb   : > { %vm448_vm2 = vcmp.lt.s32.totalorder %v441_v32, %v447_v33 }
 0x16a   : > { %v435_v34 = vpop.f32.mrb[0].mxu0 }
 0x16b   : > { %v827_v35 = vpop.f32.mrb[1].mxu0  ;;  %v449_v36 = vsel %vm448_vm2, %v435_v34, -1000000.0 }
 0x16c   : > { %451 = vmax.xlane.f32.xlu0 %v449_v36 }
 0x1f9   : > { %v452_v50 = vpop.xlane.xlu0 %451 }
 0x1fa   : > { %v453_v53 = vmax.f32 %v450_v49, %v452_v50 }
 0x1fc   : > { %v454_v55 = vsub.f32 %v450_v49, %v453_v53  ;;  %567 = vst.msk [vmem:[#allocation2] sm:$0xff] %vm347_vm0, %v453_v53  ;;  %459 = vperm.xlu1 %986, %v453_v53  }
 0x1fe   : > { %v455_v58 = vmul.f32 1.442695, %v454_v55 }
 0x200   : > { %987 = vpow2.f32 %v455_v58 }
 0x20a   : > { %v988_v3 = vpop.eup %987 }
 0x20b   : > { %475 = vperm.xlu0 %985, %v988_v3   ;;  %v466_v9 = vmul.f32 %v988_v3, %v465_v8 }
 0x27b   : > { %v460_v4 = vpop.permute.xlu1 %459 }
 0x27c   : > { %v462_v5 = vsub.f32 %v449_v36, %v460_v4 }
 0x27e   : > { %v463_v6 = vmul.f32 1.442695, %v462_v5 }
 0x280   : > { %989 = vpow2.f32 %v463_v6 }
 0x28a   : > { %v990_v7 = vpop.eup %989  ;;  %v476_v15 = vpop.permute.xlu0 %475 }
 0x28b   : > { %467 = vadd.xlane.f32.xlu1 %v990_v7  ;;  %861 = vmatmul.mubr.f32.vlgmr.msra.gmra.mrb[0].mxu1 %v990_v7  ;;  %v478_v16 = vmul.f32 0.0, %v476_v15 }
 0x318   : > { %v468_v10 = vpop.xlane.xlu1 %467 }
 0x319   : > { %v469_v11 = vadd.f32 %v468_v10, %v466_v9 }
 0x31b   : > { %471 = vst.msk [vmem:[#allocation3] sm:$0xff] %vm347_vm0, %v469_v11 }
 0x322   : > { %v571_v12 = vld [vmem:[#allocation3] sm:$0xff] }
 0x323   : > { %991 = vrcp.f32 %v571_v12 }
 0x32d   : > { %v992_v0 = vpop.eup %991 }
 0x32e   : > { %576 = vperm.xlu1 %986, %v992_v0  }
 0x35e   : > { %v561_v13 = vpop.f32.mrb[0].mxu1 }
 0x35f   : > { %v862_v14 = vpop.f32.mrb[1].mxu1  ;;  %v565_v17 = vadd.f32 %v561_v13, %v478_v16 }
 0x3ad   : > { %v577_v18 = vpop.permute.xlu1 %576 }
 0x3ae   : > { %v579_v19 = vmul.f32 %v577_v18, %v565_v17 }
 0x3b0   : > { %580 = vst [vmem:[%s326_s26] sm:$0xff] %v579_v19 }
 0x3b1   : > { %1066 = shalt.err (!%p1063_p1)
}
 0x3b2   : > { %s1067_s14 = scalar_lea.hbm %s1433_s25, 128  ;;  %s1071_s22 = scalar_lea.hbm %s1486_s4, 256 }
 0x3b3   : > { %p1068_p6 = scmp.ne.s32.totalorder %s1433_s25, %s1067_s14  ;;  %p1072_p4 = scmp.lt.u32.totalorder %s1433_s25, %s1486_s4 }
 0x3b4   : > { %p1073_p8 = scmp.lt.u32.totalorder %s1071_s22, %s1067_s14  ;;  %p1075_p3 = scmp.lt.u32.totalorder %s1067_s14, %s1433_s25 }
 0x3b5   : > { %p1069_p2 = pnand %p1068_p6, %p1499_p12 }
 0x3b6   : > { %p1074_p0 = por %p1073_p8, %p1072_p4 }
 0x3b7   : > { %p1070_p5 = pneg %p1069_p2 }
 0x3b8   : > { %p1076_p13 = por %p1075_p3, %p1074_p0 }
 0x3ba   : > { %p1077_p7 = pnand %p1076_p13, %p1070_p5 }
 0x3bc   : > { %1080 = shalt.err (!%p1077_p7)
}
 0x3bd   : > { %915 = dma.vmem_to_hbm [thread:$0]  (%p1499_p12), %s1435_s8, 128, %s1433_s25, %s582_s27  }
 0x3be PF: > { %s608_s12 = sand.u32 1, %s1119_s15   ;;  %p1500_p10 = scmp.ne.s32.totalorder %s1493_s30, 0 }
 0x3bf   : > { %p1501_p9 = scmp.ge.s32.totalorder %s1139_s20, 2  ;;  %s609_s26 = scalar_lea.sflag [#allocation7], %s608_s12 }
 0x3c1   : > { %p925_p11 = pnand %p1501_p9, %p1500_p10 }
 0x3c3   : > { %1114 = dma.done.wait (!%p925_p11), %s609_s26, 128  }
 0x3c4   : > { %1116 = vsyncadd (!%p925_p11), %s609_s26, 4294967168  ;;  %s23_s20 = sadd.s32 1, %s1139_s20   ;;  %s1502_s15 = smov %s1123_s16 }
 0x3c5   : > { %p20_p1 = scmp.ge.s32.totalorder %s23_s20, 4   ;;  %s1503_s16 = smov %s1127_s17 }
 0x3c6   : > { %s1504_s17 = smov %s1232_s29  ;;  %s1505_s18 = smov %s1135_s19 }
 0x3c7   : > { %s1506_s19 = smov %s1508_s23  ;;  %22 = sbr.rel (!%p20_p1) target bundleno = 8 (0x8), region = 108 }
 0x3ce   :  { %614 = vsyncpa [#allocation6], 1 }
 0x3cf   :  { %616 = vsyncpa [#allocation6 + $0x1], 1 }
 0x3d0   :  { %617 = vsyncpa [#allocation9], 1 }
 0x3d1   :  { %619 = vsyncpa [#allocation9 + $0x1], 1 }
 0x3d2   :  { %620 = vsyncpa [#allocation7], 1 }
 0x3d3   :  { %622 = vsyncpa [#allocation7 + $0x1], 1 }

</bundles_post_ra>
